<compile_context>
chip_gen: v7x
topology: tpu7x:2x2x1
jax: 0.10.0
libtpu: 0.0.40
codegen_flags: <defaults>
</compile_context>

<pallas_src>
import functools

import jax
import jax.numpy as jnp
from jax.experimental import pallas as pl
from jax.experimental.pallas import tpu as pltpu


# ----------------------------- router kernel ------------------------------ #
def _router_kernel(x_ref, w_ref, o_ref):
    # x: (TT, D) bf16, w: (D, E_pad) bf16 -> logits (TT, E_pad) f32.
    o_ref[...] = jnp.dot(x_ref[...], w_ref[...],
                         preferred_element_type=jnp.float32)


def router_logits_pallas(x, gate_w, *, tt):
    """x: (N, D); gate_w: (D, E).  Returns (N, E) f32 logits.

    E is padded up to 128 output lanes inside (full `vst`, full MXU N-dim);
    the pad columns are zero weights and are sliced off.
    """
    n, d = x.shape
    e = gate_w.shape[1]
    e_pad = ((e + 127) // 128) * 128
    n_pad = ((n + tt - 1) // tt) * tt
    x_p = jnp.pad(x, ((0, n_pad - n), (0, 0))) if n_pad != n else x
    w_p = jnp.pad(gate_w, ((0, 0), (0, e_pad - e))) if e_pad != e else gate_w

    out = pl.pallas_call(
        _router_kernel,
        out_shape=jax.ShapeDtypeStruct((n_pad, e_pad), jnp.float32),
        grid_spec=pltpu.PrefetchScalarGridSpec(
            num_scalar_prefetch=0,
            grid=(n_pad // tt,),
            in_specs=[
                pl.BlockSpec((tt, d), lambda t: (t, 0)),
                pl.BlockSpec((d, e_pad), lambda t: (0, 0)),
            ],
            out_specs=pl.BlockSpec((tt, e_pad), lambda t: (t, 0)),
        ),
        compiler_params=pltpu.CompilerParams(
            dimension_semantics=("parallel",)
        ),
    )(x_p, w_p)
    return out[:n, :e]


# --------------------------- grouped MoE kernel ---------------------------- #
def _moe_kernel(te_ref, x_ref, w_ref, guw_ref, dw_ref, o_ref, acc_ref):
    # Grid: (token_tiles, f_tiles).  te_ref is the scalar-prefetched
    # tile->expert map (only used by the index_maps).  Every token tile
    # belongs to exactly one expert (sorted + per-expert padded layout), so
    # consecutive tiles of the same expert reuse the resident weight block.
    f = pl.program_id(1)

    @pl.when(f == 0)
    def _():
        acc_ref[...] = jnp.zeros_like(acc_ref)

    x = x_ref[...]                                                    # (tt, D) bf16
    gu = jnp.dot(x, guw_ref[0], preferred_element_type=jnp.float32)   # (tt, 2*tf)
    tf = guw_ref.shape[-1] // 2
    g = gu[:, :tf]                                                    # lane-aligned
    u = gu[:, tf:]
    # Routing weight folded into h -> accumulator update is a pure add.
    h = (g * jax.nn.sigmoid(g) * u) * w_ref[...]                      # (tt, tf) f32
    acc_ref[...] += jnp.dot(h.astype(x.dtype), dw_ref[0],
                            preferred_element_type=jnp.float32)       # (tt, D)

    @pl.when(f == pl.num_programs(1) - 1)
    def _():
        o_ref[...] = acc_ref[...].astype(o_ref.dtype)


def moe_grouped_pallas(x_grouped, w_grouped, tile_expert, gu_w, dw, *, tt, tf):
    """x_grouped: (M_pad, D) bf16 tokens sorted by expert (per-expert padded
    to tile multiples); w_grouped: (M_pad, 1) f32 routing weights (0 on pad
    rows); tile_expert: (M_pad//tt,) i32; gu_w: (E, D, 2*F) fused gate|up
    (per-f-tile interleaved); dw: (E, F, D)."""
    m_pad, d = x_grouped.shape
    f_total = dw.shape[1]
    n_m = m_pad // tt
    n_f = f_total // tf

    def x_map(m, f, te):
        return (m, 0)

    def w_map(m, f, te):
        return (m, 0)

    def gu_map(m, f, te):
        return (te[m], 0, f)

    def dw_map(m, f, te):
        return (te[m], f, 0)

    def o_map(m, f, te):
        return (m, 0)

    # Explicit VMEM budget (double-buffered blocks + resident f32 acc),
    # with a floor at 32 MiB and a v7x-safe cap.
    blk_bytes = (tt * d * 2        # x tile
                 + tt * 4          # routing weights
                 + d * 2 * tf * 2  # fused gate|up block
                 + tf * d * 2      # down block
                 + tt * d * 2)     # output tile
    vmem_limit = int(min(max(3 * blk_bytes + tt * d * 4 + (2 << 20), 32 << 20),
                         64 << 20))

    return pl.pallas_call(
        _moe_kernel,
        out_shape=jax.ShapeDtypeStruct((m_pad, d), x_grouped.dtype),
        grid_spec=pltpu.PrefetchScalarGridSpec(
            num_scalar_prefetch=1,
            grid=(n_m, n_f),
            in_specs=[
                pl.BlockSpec((tt, d), x_map),            # grouped tokens
                pl.BlockSpec((tt, 1), w_map),            # routing weights
                pl.BlockSpec((1, d, 2 * tf), gu_map),    # fused gate|up
                pl.BlockSpec((1, tf, d), dw_map),        # down_proj
            ],
            out_specs=pl.BlockSpec((tt, d), o_map),
            scratch_shapes=[pltpu.VMEM((tt, d), jnp.float32)],
        ),
        compiler_params=pltpu.CompilerParams(
            dimension_semantics=("parallel", "arbitrary"),
            vmem_limit_bytes=vmem_limit,
        ),
    )(tile_expert, x_grouped, w_grouped, gu_w, dw)


# ------------------------------ full module ------------------------------- #
@functools.partial(jax.jit, static_argnames=("top_k", "token_tile", "f_tile"))
def moe_mlp_forward(hidden_states, gate_w, gw, uw, dw, *, top_k, token_tile,
                    f_tile):
    b, s, d = hidden_states.shape
    e = gate_w.shape[1]
    f_total = gw.shape[-1]
    n = b * s
    tt = token_tile
    tf = f_tile
    assert f_total % tf == 0 and tf % 128 == 0
    n_f = f_total // tf
    x = hidden_states.reshape(n, d)

    # ---- router (Pallas matmul, f32 acc, lane-padded output) ----
    logits_f32 = router_logits_pallas(x, gate_w, tt=tt)              # (N, E)
    router_logits = logits_f32.astype(hidden_states.dtype)           # module dtype
    probs = jax.nn.softmax(router_logits.astype(jnp.float32), axis=-1)
    top_w, top_idx = jax.lax.top_k(probs, top_k)
    top_w = top_w / jnp.sum(top_w, axis=-1, keepdims=True)           # (N, K) f32

    # ---- grouped ("sorted by expert") layout, all plain-JAX glue ----
    nk = n * top_k
    expert_ids = top_idx.reshape(nk).astype(jnp.int32)
    token_ids = jnp.arange(nk, dtype=jnp.int32) // top_k
    assign_w = top_w.reshape(nk)

    sort_ord = jnp.argsort(expert_ids)                                # stable
    e_sorted = expert_ids[sort_ord]
    t_sorted = token_ids[sort_ord]
    w_sorted = assign_w[sort_ord]

    counts = jnp.bincount(expert_ids, length=e)                       # (E,)
    padded_sizes = ((counts + tt - 1) // tt) * tt                     # per-expert
    padded_ends = jnp.cumsum(padded_sizes)
    padded_starts = padded_ends - padded_sizes
    unpadded_starts = jnp.cumsum(counts) - counts

    # Padded position of each sorted assignment.
    pos = (padded_starts[e_sorted]
           + (jnp.arange(nk, dtype=jnp.int32) - unpadded_starts[e_sorted]))

    # Static upper bound on the padded assignment count.
    m_pad = ((nk + e * (tt - 1)) + tt - 1) // tt * tt
    n_m = m_pad // tt

    token_ids_p = jnp.zeros((m_pad,), jnp.int32).at[pos].set(t_sorted)
    w_p = jnp.zeros((m_pad, 1), jnp.float32).at[pos, 0].set(w_sorted)
    x_grouped = jnp.take(x, token_ids_p, axis=0)                      # (M_pad, D)

    # tile -> expert map (each tile belongs to exactly one expert; trailing
    # dead tiles clamp to the last expert and carry zero routing weight).
    tile_start = jnp.arange(n_m, dtype=jnp.int32) * tt
    tile_expert = jnp.minimum(
        jnp.searchsorted(padded_ends, tile_start, side="right"), e - 1
    ).astype(jnp.int32)

    # Fused gate|up weights, per-f-tile interleaved: [gate_f | up_f].
    gu_w = jnp.concatenate(
        [gw.reshape(e, d, n_f, tf), uw.reshape(e, d, n_f, tf)], axis=-1
    ).reshape(e, d, 2 * f_total)

    y_grouped = moe_grouped_pallas(x_grouped, w_p, tile_expert, gu_w, dw,
                                   tt=tt, tf=tf)                      # (M_pad, D)

    # Un-sort and combine the top_k expert outputs per token.
    pos_by_assign = jnp.zeros((nk,), jnp.int32).at[sort_ord].set(pos)
    y_assign = jnp.take(y_grouped, pos_by_assign, axis=0)             # (NK, D)
    out = jnp.sum(y_assign.reshape(n, top_k, d).astype(jnp.float32), axis=1)
    out = out.astype(hidden_states.dtype).reshape(b, s, d)
    return out, router_logits


# ------------------------------- reference -------------------------------- #
def moe_from_logits_reference(x, router_logits, gw, uw, dw, *, top_k):
    """Plain-JAX f32 reference for the expert mixture, driven by the same
    router logits (so the test cannot flake on near-tie top-k selections)."""
    n, d = x.shape
    num_experts = gw.shape[0]
    probs = jax.nn.softmax(router_logits.astype(jnp.float32), axis=-1)
    top_w, top_idx = jax.lax.top_k(probs, top_k)
    top_w = top_w / jnp.sum(top_w, axis=-1, keepdims=True)
    one_hot = jax.nn.one_hot(top_idx, num_experts, dtype=jnp.float32)
    dense_w = jnp.sum(one_hot * top_w[..., None], axis=1)             # (N, E)
    x32 = x.astype(jnp.float32)
    out = jnp.zeros((n, d), jnp.float32)
    for ex in range(num_experts):
        g = x32 @ gw[ex].astype(jnp.float32)
        u = x32 @ uw[ex].astype(jnp.float32)
        h = g * jax.nn.sigmoid(g) * u
        y = h @ dw[ex].astype(jnp.float32)
        out = out + y * dense_w[:, ex:ex + 1]
    return out


# --------------------------------- main ------------------------------------ #
if __name__ == "__main__":
    # Small but 128-aligned (lane-dense) shapes consistent with the module.
    batch, seq = 2, 96                    # N = 192 tokens
    model_dim, expert_dim = 128, 256
    num_experts, top_k = 8, 2
    token_tile = 128
    dtype = jnp.bfloat16

    key = jax.random.PRNGKey(0)
    k_x, k_g, k_gw, k_uw, k_dw = jax.random.split(key, 5)

    hidden_states = (
        jax.random.normal(k_x, (batch, seq, model_dim), jnp.float32) * 0.5
    ).astype(dtype)

    # torch Linear stores (out, in); we store the transposed layout so the
    # kernel does plain x @ W with no in-kernel transpose.
    scale_d = 1.0 / jnp.sqrt(model_dim)
    scale_f = 1.0 / jnp.sqrt(expert_dim)
    gate_w = (jax.random.normal(k_g, (model_dim, num_experts), jnp.float32)
              * scale_d).astype(dtype)                                 # router
    gw = (jax.random.normal(k_gw, (num_experts, model_dim, expert_dim),
                            jnp.float32) * scale_d).astype(dtype)      # gate_proj
    uw = (jax.random.normal(k_uw, (num_experts, model_dim, expert_dim),
                            jnp.float32) * scale_d).astype(dtype)      # up_proj
    dw = (jax.random.normal(k_dw, (num_experts, expert_dim, model_dim),
                            jnp.float32) * scale_f).astype(dtype)      # down_proj

    n_tok = batch * seq
    x2d = hidden_states.reshape(n_tok, model_dim)

    # Run twice: f_tile=F (n_f=1, full per-expert weight reuse — the
    # recommended config when the weight blocks fit VMEM) and f_tile=F/2
    # (exercises the F-tiled accumulator path used at production F).
    for f_tile in (expert_dim, expert_dim // 2):
        out, router_logits = moe_mlp_forward(
            hidden_states, gate_w, gw, uw, dw,
            top_k=top_k, token_tile=token_tile, f_tile=f_tile,
        )
        out = jax.block_until_ready(out)
        router_logits = jax.block_until_ready(router_logits)

        assert out.shape == (batch, seq, model_dim) and out.dtype == dtype
        assert router_logits.shape == (n_tok, num_experts)

        # Router kernel vs plain-JAX matmul (same bf16 inputs, f32 acc).
        ref_logits = jnp.dot(x2d, gate_w, preferred_element_type=jnp.float32)
        assert jnp.allclose(router_logits.astype(jnp.float32), ref_logits,
                            atol=5e-2, rtol=5e-2)

        # MoE expert kernel vs f32 reference driven by the same logits.
        ref_out = moe_from_logits_reference(
            x2d, router_logits, gw, uw, dw, top_k=top_k
        ).reshape(batch, seq, model_dim)
        assert jnp.allclose(out.astype(jnp.float32), ref_out,
                            atol=5e-2, rtol=5e-2)

    print("KERNEL_OK")
</pallas_src>

<mosaic_0001>
module attributes {stable_mosaic.version = 11 : i64} {
  func.func private @main(%arg0: i32) attributes {dimension_semantics = [#tpu.dimension_semantics<core_parallel>], iteration_bounds = array<i64: 2>, tpu.core_type = #tpu.core_type<sc_scalar_subcore>, window_params = []} {
    return
  }
}

module attributes {stable_mosaic.version = 11 : i64} {
  func.func private @main(%arg0: i32) attributes {dimension_semantics = [#tpu.dimension_semantics<core_parallel>], iteration_bounds = array<i64: 2>, tpu.core_type = #tpu.core_type<sc_scalar_subcore>, window_params = []} {
    return
  }
}

module attributes {stable_mosaic.version = 11 : i64} {
  func.func @_router_kernel(%arg0: i32, %arg1: memref<128x128xbf16, #tpu.memory_space<vmem>>, %arg2: memref<128x128xbf16, #tpu.memory_space<vmem>>, %arg3: memref<128x128xf32, #tpu.memory_space<vmem>>) attributes {dimension_semantics = [#tpu.dimension_semantics<parallel>], iteration_bounds = array<i64: 2>, scalar_prefetch = 0 : i64, scratch_operands = 0 : i64, tpu.core_type = #tpu.core_type<tc>, window_params = [{transform_indices = @transform_0, window_bounds = array<i64: 128, 128>}, {pipeline_mode = #tpu.pipeline_mode<synchronous>, transform_indices = @transform_1, window_bounds = array<i64: 128, 128>}, {transform_indices = @transform_2, window_bounds = array<i64: 128, 128>}]} {
    %c0 = arith.constant 0 : index
    %c0_0 = arith.constant 0 : index
    %0 = vector.load %arg1[%c0, %c0_0] : memref<128x128xbf16, #tpu.memory_space<vmem>>, vector<128x128xbf16>
    %c0_1 = arith.constant 0 : index
    %c0_2 = arith.constant 0 : index
    %1 = vector.load %arg2[%c0_1, %c0_2] : memref<128x128xbf16, #tpu.memory_space<vmem>>, vector<128x128xbf16>
    %cst = arith.constant dense<0.000000e+00> : vector<128x128xf32>
    %2 = tpu.matmul %0, %1, %cst {dimension_numbers = #tpu.dot_dimension_numbers<[1], [0], [0], [1], [0, 0, 1, 1], [], []>} : vector<128x128xbf16>, vector<128x128xbf16>, vector<128x128xf32> -> vector<128x128xf32>
    %c0_3 = arith.constant 0 : index
    %c0_4 = arith.constant 0 : index
    %3 = vector.load %arg3[%c0_3, %c0_4] : memref<128x128xf32, #tpu.memory_space<vmem>>, vector<128x128xf32>
    tpu.vector_store %arg3[%c0_3, %c0_4], %2 {strides = array<i32>} : memref<128x128xf32, #tpu.memory_space<vmem>>, vector<128x128xf32>,
    return
  }
  func.func @transform_0(%arg0: i32) -> (i32, i32) {
    %c0_i32 = arith.constant 0 : i32
    %c0_i32_0 = arith.constant 0 : i32
    return %arg0, %c0_i32 : i32, i32
  }
  func.func @transform_1(%arg0: i32) -> (i32, i32) {
    %c0_i32 = arith.constant 0 : i32
    %c0_i32_0 = arith.constant 0 : i32
    %c0_i32_1 = arith.constant 0 : i32
    return %c0_i32, %c0_i32_0 : i32, i32
  }
  func.func @transform_2(%arg0: i32) -> (i32, i32) {
    %c0_i32 = arith.constant 0 : i32
    %c0_i32_0 = arith.constant 0 : i32
    return %arg0, %c0_i32 : i32, i32
  }
}

module attributes {stable_mosaic.version = 11 : i64} {
  func.func @_moe_kernel(%arg0: i32, %arg1: i32, %arg2: memref<11xi32, #tpu.memory_space<smem>>, %arg3: memref<128x128xbf16, #tpu.memory_space<vmem>>, %arg4: memref<128x1xf32, #tpu.memory_space<vmem>>, %arg5: memref<1x128x512xbf16, #tpu.memory_space<vmem>>, %arg6: memref<1x256x128xbf16, #tpu.memory_space<vmem>>, %arg7: memref<128x128xbf16, #tpu.memory_space<vmem>>, %arg8: memref<128x128xf32, #tpu.memory_space<vmem>>) attributes {dimension_semantics = [#tpu.dimension_semantics<parallel>, #tpu.dimension_semantics<arbitrary>], iteration_bounds = array<i64: 11, 1>, scalar_prefetch = 1 : i64, scratch_operands = 1 : i64, tpu.core_type = #tpu.core_type<tc>, window_params = [{transform_indices = @transform_0, window_bounds = array<i64: 128, 128>}, {transform_indices = @transform_1, window_bounds = array<i64: 128, 1>}, {transform_indices = @transform_2, window_bounds = array<i64: 1, 128, 512>}, {transform_indices = @transform_3, window_bounds = array<i64: 1, 256, 128>}, {transform_indices = @transform_4, window_bounds = array<i64: 128, 128>}]} {
    %c0_i32 = arith.constant 0 : i32
    %0 = arith.cmpi eq, %arg1, %c0_i32 : i32
    %1 = arith.extui %0 : i1 to i32
    %c0_i32_0 = arith.constant 0 : i32
    %2 = arith.cmpi ne, %1, %c0_i32_0 : i32
    scf.if %2 {
      %cst_18 = arith.constant 0.000000e+00 : f32
      %29 = vector.broadcast %cst_18 : f32 to vector<128x128xf32>
      %c0_19 = arith.constant 0 : index
      %c0_20 = arith.constant 0 : index
      %30 = vector.load %arg8[%c0_19, %c0_20] : memref<128x128xf32, #tpu.memory_space<vmem>>, vector<128x128xf32>
      tpu.vector_store %arg8[%c0_19, %c0_20], %29 {strides = array<i32>} : memref<128x128xf32, #tpu.memory_space<vmem>>, vector<128x128xf32>,
    } else {
    }
    %c0 = arith.constant 0 : index
    %c0_1 = arith.constant 0 : index
    %3 = vector.load %arg3[%c0, %c0_1] : memref<128x128xbf16, #tpu.memory_space<vmem>>, vector<128x128xbf16>
    %c0_2 = arith.constant 0 : index
    %c0_3 = arith.constant 0 : index
    %c0_4 = arith.constant 0 : index
    %4 = vector.load %arg5[%c0_2, %c0_3, %c0_4] : memref<1x128x512xbf16, #tpu.memory_space<vmem>>, vector<1x128x512xbf16>
    %5 = vector.shape_cast %4 : vector<1x128x512xbf16> to vector<128x512xbf16>
    %cst = arith.constant dense<0.000000e+00> : vector<128x512xf32>
    %6 = tpu.matmul %3, %5, %cst {dimension_numbers = #tpu.dot_dimension_numbers<[1], [0], [0], [1], [0, 0, 1, 1], [], []>} : vector<128x128xbf16>, vector<128x512xbf16>, vector<128x512xf32> -> vector<128x512xf32>
    %7 = vector.extract_strided_slice %6 {offsets = [0, 0], sizes = [128, 256], strides = [1, 1]} : vector<128x512xf32> to vector<128x256xf32>
    %8 = vector.extract_strided_slice %6 {offsets = [0, 256], sizes = [128, 256], strides = [1, 1]} : vector<128x512xf32> to vector<128x256xf32>
    %9 = arith.negf %7 : vector<128x256xf32>
    %10 = math.exp %9 : vector<128x256xf32>
    %cst_5 = arith.constant 1.000000e+00 : f32
    %11 = vector.broadcast %cst_5 : f32 to vector<128x256xf32>
    %12 = arith.addf %11, %10 : vector<128x256xf32>
    %13 = arith.divf %11, %12 : vector<128x256xf32>
    %14 = arith.mulf %7, %13 : vector<128x256xf32>
    %15 = arith.mulf %14, %8 : vector<128x256xf32>
    %c0_6 = arith.constant 0 : index
    %c0_7 = arith.constant 0 : index
    %16 = vector.load %arg4[%c0_6, %c0_7] : memref<128x1xf32, #tpu.memory_space<vmem>>, vector<128x1xf32>
    %17 = vector.broadcast %16 : vector<128x1xf32> to vector<128x256xf32>
    %18 = arith.mulf %15, %17 : vector<128x256xf32>
    %c0_8 = arith.constant 0 : index
    %c0_9 = arith.constant 0 : index
    %19 = vector.load %arg8[%c0_8, %c0_9] : memref<128x128xf32, #tpu.memory_space<vmem>>, vector<128x128xf32>
    %20 = arith.truncf %18 : vector<128x256xf32> to vector<128x256xbf16>
    %c0_10 = arith.constant 0 : index
    %c0_11 = arith.constant 0 : index
    %c0_12 = arith.constant 0 : index
    %21 = vector.load %arg6[%c0_10, %c0_11, %c0_12] : memref<1x256x128xbf16, #tpu.memory_space<vmem>>, vector<1x256x128xbf16>
    %22 = vector.shape_cast %21 : vector<1x256x128xbf16> to vector<256x128xbf16>
    %cst_13 = arith.constant dense<0.000000e+00> : vector<128x128xf32>
    %23 = tpu.matmul %20, %22, %cst_13 {dimension_numbers = #tpu.dot_dimension_numbers<[1], [0], [0], [1], [0, 0, 1, 1], [], []>} : vector<128x256xbf16>, vector<256x128xbf16>, vector<128x128xf32> -> vector<128x128xf32>
    %24 = arith.addf %19, %23 : vector<128x128xf32>
    %c0_14 = arith.constant 0 : index
    %c0_15 = arith.constant 0 : index
    %25 = vector.load %arg8[%c0_14, %c0_15] : memref<128x128xf32, #tpu.memory_space<vmem>>, vector<128x128xf32>
    tpu.vector_store %arg8[%c0_14, %c0_15], %24 {strides = array<i32>} : memref<128x128xf32, #tpu.memory_space<vmem>>, vector<128x128xf32>,
    %c0_i32_16 = arith.constant 0 : i32
    %26 = arith.cmpi eq, %arg1, %c0_i32_16 : i32
    %27 = arith.extui %26 : i1 to i32
    %c0_i32_17 = arith.constant 0 : i32
    %28 = arith.cmpi ne, %27, %c0_i32_17 : i32
    scf.if %28 {
      %c0_18 = arith.constant 0 : index
      %c0_19 = arith.constant 0 : index
      %29 = vector.load %arg8[%c0_18, %c0_19] : memref<128x128xf32, #tpu.memory_space<vmem>>, vector<128x128xf32>
      %30 = arith.truncf %29 : vector<128x128xf32> to vector<128x128xbf16>
      %c0_20 = arith.constant 0 : index
      %c0_21 = arith.constant 0 : index
      %31 = vector.load %arg7[%c0_20, %c0_21] : memref<128x128xbf16, #tpu.memory_space<vmem>>, vector<128x128xbf16>
      tpu.vector_store %arg7[%c0_20, %c0_21], %30 {strides = array<i32>} : memref<128x128xbf16, #tpu.memory_space<vmem>>, vector<128x128xbf16>,
    } else {
    }
    return
  }
  func.func @transform_0(%arg0: i32, %arg1: i32, %arg2: memref<11xi32, #tpu.memory_space<smem>>) -> (i32, i32) {
    %c0_i32 = arith.constant 0 : i32
    %c0_i32_0 = arith.constant 0 : i32
    return %arg0, %c0_i32 : i32, i32
  }
  func.func @transform_1(%arg0: i32, %arg1: i32, %arg2: memref<11xi32, #tpu.memory_space<smem>>) -> (i32, i32) {
    %c0_i32 = arith.constant 0 : i32
    %c0_i32_0 = arith.constant 0 : i32
    return %arg0, %c0_i32 : i32, i32
  }
  func.func @transform_2(%arg0: i32, %arg1: i32, %arg2: memref<11xi32, #tpu.memory_space<smem>>) -> (i32, i32, i32) {
    %0 = arith.index_cast %arg0 : i32 to index
    %1 = memref.load %arg2[%0] : memref<11xi32, #tpu.memory_space<smem>>
    %c0_i32 = arith.constant 0 : i32
    %c0_i32_0 = arith.constant 0 : i32
    return %1, %c0_i32, %arg1 : i32, i32, i32
  }
  func.func @transform_3(%arg0: i32, %arg1: i32, %arg2: memref<11xi32, #tpu.memory_space<smem>>) -> (i32, i32, i32) {
    %0 = arith.index_cast %arg0 : i32 to index
    %1 = memref.load %arg2[%0] : memref<11xi32, #tpu.memory_space<smem>>
    %c0_i32 = arith.constant 0 : i32
    %c0_i32_0 = arith.constant 0 : i32
    return %1, %arg1, %c0_i32 : i32, i32, i32
  }
  func.func @transform_4(%arg0: i32, %arg1: i32, %arg2: memref<11xi32, #tpu.memory_space<smem>>) -> (i32, i32) {
    %c0_i32 = arith.constant 0 : i32
    %c0_i32_0 = arith.constant 0 : i32
    return %arg0, %c0_i32 : i32, i32
  }
}

</mosaic_0001>

<bundles_post_ra>
// kernel: custom-call.1
= control target key start
LH: loop header
LB: loop body
LE: loop exit
PB: predicated region body
PF: predicated region fallthrough
CT: control target
= control target key end

     0   :  { %s6_s0 = inlined_call_operand.vmem [shape: u32[11], index: 0, kind: output, shape index: {}]  }

// kernel: moe_mlp_forward.2
= control target key start
LH: loop header
LB: loop body
LE: loop exit
PB: predicated region body
PF: predicated region fallthrough
CT: control target
= control target key end

     0   :  { %s583_s9 = smov 0   ;;  %s656_s0 = inlined_call_operand.vmem [shape: bf16[256,128], index: 0, kind: input, shape index: {}]   ;;  %s657_s1 = inlined_call_operand.vmem [shape: bf16[128,128], index: 1, kind: input, shape index: {}]   ;;  %s658_s2 = inlined_call_operand.vmem [shape: f32[256,128], index: 2, kind: output, shape index: {}]  }
   0x1 LB: > { %s445_s10 = sadd.s32 4294967295, %s566_s9   ;;  %p449_p0 = scmp.ge.s32.totalorder %s566_s9, 1  ;;  %s566_s9 = sphi %s583_s9, %s12_s9  }
   0x2   : > { %p113_p1 = scmp.lt.s32.totalorder %s566_s9, 3 }
   0x4   : > { %p114_p2 = pnand %p449_p0, %p113_p1 }
   0x5   : > { %v544_v0 = vld [vmem:[%s657_s1] sm:$0xff] (!%p114_p2)   ;;  %s450_s13 = sshll.u32 (!%p114_p2), %s445_s10, 4  ;;  %v545_v1 = vld [vmem:[%s657_s1 + $0x8] sm:$0xff] (!%p114_p2)   ;;  %v546_v2 = vld [vmem:[%s657_s1 + $0x10] sm:$0xff] (!%p114_p2)  }
   0x6   : > { %117 = sbr.rel (%p114_p2) target bundleno = 262 (0x106), region = 28  ;;  %p136_p3 = scmp.lt.s32.totalorder (!%p114_p2), %s450_s13, 31  ;;  %488 = vmatprep.subr.bf16.mxu0 (!%p114_p2), %v544_v0  ;;  %520 = vmatprep.subr.bf16.mxu1 (!%p114_p2), %v544_v0  ;;  %v547_v3 = vld [vmem:[%s657_s1 + $0x18] sm:$0xff] (!%p114_p2)   ;;  %v548_v6 = vld [vmem:[%s657_s1 + $0x20] sm:$0xff] (!%p114_p2)   ;;  %v549_v7 = vld [vmem:[%s657_s1 + $0x28] sm:$0xff] (!%p114_p2)  }
   0x7   : > { %489 = vmatpush3.bf16.msra.mxu0 (!%p114_p2), %v544_v0  ;;  %528 = vmatpush3.bf16.msra.mxu1 (!%p114_p2), %v544_v0  ;;  %v550_v8 = vld [vmem:[%s657_s1 + $0x30] sm:$0xff] (!%p114_p2)   ;;  %v551_v9 = vld [vmem:[%s657_s1 + $0x38] sm:$0xff] (!%p114_p2)  }
   0x8   : > { %490 = vmatprep.subr.bf16.mxu0 (!%p114_p2), %v545_v1  ;;  %521 = vmatprep.subr.bf16.mxu1 (!%p114_p2), %v545_v1 }
   0xb   : > { %491 = vmatpush3.bf16.msra.mxu0 (!%p114_p2), %v545_v1  ;;  %529 = vmatpush3.bf16.msra.mxu1 (!%p114_p2), %v545_v1 }
   0xc   : > { %492 = vmatprep.subr.bf16.mxu0 (!%p114_p2), %v546_v2  ;;  %522 = vmatprep.subr.bf16.mxu1 (!%p114_p2), %v546_v2 }
   0xd   : > { %s660_s13 = smov (!%p136_p3, %s450_s13), 31 }
   0xe   : > { %s451_s18 = sshll.u32 %s660_s13, 2  ;;  %s453_s4 = sshll.u32 %s660_s13, 3 }
   0xf   : > { %s606_s21 = scalar_lea.vmem %s656_s0, %s451_s18  ;;  %493 = vmatpush3.bf16.msra.mxu0 %v546_v2  ;;  %530 = vmatpush3.bf16.msra.mxu1 %v546_v2  ;;  %s635_s7 = scalar_lea.vmem %s658_s2, %s453_s4 }
  0x10   : > { %v552_v4 = vld [vmem:[%s606_s21] sm:$0xff]   ;;  %494 = vmatprep.subr.bf16.mxu0 %v547_v3  ;;  %523 = vmatprep.subr.bf16.mxu1 %v547_v3  ;;  %v554_v10 = vld [vmem:[%s606_s21 + $0x8] sm:$0xff]   ;;  %v556_v12 = vld [vmem:[%s606_s21 + $0x10] sm:$0xff]  }
  0x11   : > { %v553_v5 = vld [vmem:[%s606_s21 + $0x20] sm:$0xff]   ;;  %504 = vmatprep.mubr.bf16.mxu0 %v552_v4  ;;  %v555_v11 = vld [vmem:[%s606_s21 + $0x28] sm:$0xff]   ;;  %v557_v13 = vld [vmem:[%s606_s21 + $0x30] sm:$0xff]  }
  0x12   : > { %512 = vmatprep.mubr.bf16.mxu1 %v553_v5  ;;  %v558_v14 = vld [vmem:[%s606_s21 + $0x18] sm:$0xff]  }
  0x13   : > { %495 = vmatpush3.bf16.msra.mxu0 %v547_v3  ;;  %531 = vmatpush3.bf16.msra.mxu1 %v547_v3  ;;  %v559_v15 = vld [vmem:[%s606_s21 + $0x38] sm:$0xff]  }
  0x14   : > { %496 = vmatprep.subr.bf16.mxu0 %v548_v6  ;;  %524 = vmatprep.subr.bf16.mxu1 %v548_v6 }
  0x17   : > { %497 = vmatpush3.bf16.msra.mxu0 %v548_v6  ;;  %532 = vmatpush3.bf16.msra.mxu1 %v548_v6 }
  0x18   : > { %498 = vmatprep.subr.bf16.mxu0 %v549_v7  ;;  %525 = vmatprep.subr.bf16.mxu1 %v549_v7 }
  0x1b   : > { %499 = vmatpush3.bf16.msra.mxu0 %v549_v7  ;;  %533 = vmatpush3.bf16.msra.mxu1 %v549_v7 }
  0x1c   : > { %500 = vmatprep.subr.bf16.mxu0 %v550_v8  ;;  %526 = vmatprep.subr.bf16.mxu1 %v550_v8 }
  0x1f   : > { %501 = vmatpush3.bf16.msra.mxu0 %v550_v8  ;;  %534 = vmatpush3.bf16.msra.mxu1 %v550_v8 }
  0x20   : > { %502 = vmatprep.subr.bf16.mxu0 %v551_v9  ;;  %527 = vmatprep.subr.bf16.mxu1 %v551_v9 }
  0x23   : > { %503 = vmatpush3.bf16.msra.mxu0 %v551_v9  ;;  %535 = vmatpush3.bf16.msra.mxu1 %v551_v9 }
  0x26   : > { %505 = vmatmul.mubr.bf16.vlgmr.msra.gmra.mrb[0].mxu0 %v554_v10  ;;  %513 = vmatmul.mubr.bf16.vlgmr.msra.gmra.mrb[0].mxu1 %v555_v11 }
  0x27   : > { %508 = vmatprep.mubr.bf16.mxu0 %v556_v12  ;;  %516 = vmatprep.mubr.bf16.mxu1 %v557_v13 }
  0x2e   : > { %509 = vmatmul.mubr.bf16.gmra.mrb[4].mxu0 %v558_v14  ;;  %517 = vmatmul.mubr.bf16.gmra.mrb[4].mxu1 %v559_v15 }
  0xf9   : > { %v506_v16 = vpop.f32.mrb[0].mxu0  ;;  %v514_v17 = vpop.f32.mrb[0].mxu1 }
  0xfa   : > { %375 = vst [vmem:[%s635_s7 + $0x10] sm:$0xff] %v506_v16  ;;  %383 = vst [vmem:[%s635_s7 + $0x50] sm:$0xff] %v514_v17  ;;  %v310_v18 = vpop.f32.mrb[1].mxu0  ;;  %v342_v19 = vpop.f32.mrb[1].mxu1 }
  0xfb   : > { %373 = vst [vmem:[%s635_s7] sm:$0xff] %v310_v18  ;;  %381 = vst [vmem:[%s635_s7 + $0x40] sm:$0xff] %v342_v19  ;;  %v507_v20 = vpop.f32.mrb[2].mxu0  ;;  %v515_v21 = vpop.f32.mrb[2].mxu1 }
  0xfc   : > { %376 = vst [vmem:[%s635_s7 + $0x18] sm:$0xff] %v507_v20  ;;  %384 = vst [vmem:[%s635_s7 + $0x58] sm:$0xff] %v515_v21  ;;  %v313_v22 = vpop.f32.mrb[3].mxu0  ;;  %v345_v23 = vpop.f32.mrb[3].mxu1 }
  0xfd   : > { %374 = vst [vmem:[%s635_s7 + $0x8] sm:$0xff] %v313_v22  ;;  %382 = vst [vmem:[%s635_s7 + $0x48] sm:$0xff] %v345_v23 }
 0x101   : > { %v510_v24 = vpop.f32.mrb[4].mxu0  ;;  %v518_v25 = vpop.f32.mrb[4].mxu1 }
 0x102   : > { %379 = vst [vmem:[%s635_s7 + $0x30] sm:$0xff] %v510_v24  ;;  %387 = vst [vmem:[%s635_s7 + $0x70] sm:$0xff] %v518_v25  ;;  %v326_v26 = vpop.f32.mrb[5].mxu0  ;;  %v358_v27 = vpop.f32.mrb[5].mxu1 }
 0x103   : > { %377 = vst [vmem:[%s635_s7 + $0x20] sm:$0xff] %v326_v26  ;;  %385 = vst [vmem:[%s635_s7 + $0x60] sm:$0xff] %v358_v27  ;;  %v511_v28 = vpop.f32.mrb[6].mxu0  ;;  %v519_v29 = vpop.f32.mrb[6].mxu1 }
 0x104   : > { %380 = vst [vmem:[%s635_s7 + $0x38] sm:$0xff] %v511_v28  ;;  %388 = vst [vmem:[%s635_s7 + $0x78] sm:$0xff] %v519_v29  ;;  %v329_v30 = vpop.f32.mrb[7].mxu0  ;;  %v361_v31 = vpop.f32.mrb[7].mxu1 }
 0x105   : > { %378 = vst [vmem:[%s635_s7 + $0x28] sm:$0xff] %v329_v30  ;;  %386 = vst [vmem:[%s635_s7 + $0x68] sm:$0xff] %v361_v31 }
 0x106 PF: > { %s12_s9 = sadd.s32 1, %s566_s9  }
 0x107   : > { %p9_p4 = scmp.ge.s32.totalorder %s12_s9, 4  }
 0x109   :  { %11 = sbr.rel (!%p9_p4) target bundleno = 1 (0x1), region = 58 }

// kernel: moe_mlp_forward.3
= control target key start
LH: loop header
LB: loop body
LE: loop exit
PB: predicated region body
PF: predicated region fallthrough
CT: control target
= control target key end

     0   :  { %s2652_s0 = inlined_call_operand.vmem [shape: s32[11], index: 0, kind: input, shape index: {}]   ;;  %s2653_s1 = inlined_call_operand.vmem [shape: bf16[1408,128], index: 1, kind: input, shape index: {}]   ;;  %s2654_s2 = inlined_call_operand.vmem [shape: f32[1408,1], index: 2, kind: input, shape index: {}]   ;;  %s2655_s3 = inlined_call_operand.vmem [shape: bf16[8,128,512], index: 3, kind: input, shape index: {}]   ;;  %s2656_s4 = inlined_call_operand.vmem [shape: bf16[8,256,128], index: 4, kind: input, shape index: {}]   ;;  %s2657_s5 = inlined_call_operand.vmem [shape: bf16[1408,128], index: 5, kind: output, shape index: {}]  }
   0x1   :  { %s10_s20 = sshll.u32 %s2652_s0, 4  ;;  %s11_s20 = int_to_ptr.vmem [resolvable:$true] %s10_s20 }
   0x2   :  { %s2210_s21 = scalar_lea.vmem %s11_s20, 16  ;;  %p2215_p1 = scmp.lt.s32.totalorder %s11_s20, %s11_s20 }
   0x3   :  { %p2211_p0 = scmp.ne.s32.totalorder %s11_s20, %s2210_s21  ;;  %p2216_p2 = scmp.lt.s32.totalorder %s2210_s21, %s2210_s21 }
   0x5   :  { %p2217_p3 = por %p2216_p2, %p2215_p1 }
   0x7   :  { %p2218_p4 = pnand %p2217_p3, %p2211_p0 }
   0x9   :  { %2221 = shalt.err (!%p2218_p4)  }
   0xa   :  { %s2248_s22 = smov [#allocation4]  }
   0xb   :  { %13 = dma.vmem_to_smem %s11_s20, 16, %s2248_s22, [#allocation3] }
   0xc   :  { %2234 = dma.done.wait [#allocation3], 16 }
   0xd   :  { %2235 = vsyncadd [#allocation3], 4294967280 }
   0xe   :  { %15 = sfence }
   0xf   :  { %s2283_s23 = smov 0   ;;  %s2285_s24 = smov 0  }
  0x10   :  { %s2287_s25 = smov 0  }
  0x11 LB: > { %s33_s0 = sadd.s32 1, %s2242_s24  ;;  %p1720_p5 = scmp.ge.s32.totalorder %s2246_s25, 1  ;;  %s2246_s25 = sphi %s2287_s25, %s21_s25   ;;  %s2242_s24 = sphi %s2285_s24, %s2660_s24   ;;  %s2238_s23 = sphi %s2283_s23, %s2659_s23  }
  0x12   : > { %p35_p6 = scmp.ge.s32.totalorder %s33_s0, 11  ;;  %p235_p7 = scmp.lt.s32.totalorder %s2246_s25, 12 }
  0x14   : > { %s2662_s0 = smov (%p35_p6, %s33_s0), 0  ;;  %p236_p8 = pnand %p1720_p5, %p235_p7 }
  0x15   : > { %s298_s26 = sld [smem:[#allocation4 + %s2238_s23]] (!%p236_p8)  ;;  %s1721_s27 = sshll.u32 (!%p236_p8), %s2238_s23, 4  ;;  %v2249_v0 = vmov (!%p236_p8), 0  }
  0x16   : > { %239 = sbr.rel (%p236_p8) target bundleno = 620 (0x26c), region = 36  ;;  %637 = vmatprep.mubr.bf16.mxu0 (!%p236_p8), %v2249_v0  ;;  %677 = vmatprep.mubr.bf16.mxu1 (!%p236_p8), %v2249_v0  ;;  %p287_p9 = scmp.lt.s32.totalorder (!%p236_p8), %s1721_s27, 175 }
  0x17   : > { %2008 = vset.pattern.permute.xlu0 (!%p236_p8), %v2249_v0  ;;  %2009 = vset.pattern.permute.xlu1 (!%p236_p8), %v2249_v0  ;;  %s310_s15 = sld [smem:[#allocation4 + %s2238_s23]] (!%p236_p8) }
  0x1b   : > { %p300_p10 = scmp.lt.s32.totalorder (!%p236_p8), %s298_s26, 7 }
  0x1d   : > { %s2664_s27 = smov (!%p287_p9, %s1721_s27), 175  ;;  %s2666_s26 = smov (!%p300_p10, %s298_s26), 7 }
  0x1e   : > { %s1722_s28 = sshll.u32 %s2664_s27, 2  ;;  %s1837_s7 = sshll.u32 %s2666_s26, 8 }
  0x1f   : > { %s2317_s6 = scalar_lea.vmem %s2653_s1, %s1722_s28  ;;  %s2322_s10 = scalar_lea.vmem %s2655_s3, %s1837_s7 }
  0x20   : > { %v2010_v1 = vld [vmem:[%s2322_s10 + $0x4] ss:$16 sps:$4 sm:$0xff]   ;;  %v2012_v2 = vld [vmem:[%s2322_s10] ss:$16 sps:$4 sm:$0xff]   ;;  %s1724_s11 = sshll.u32 %s2664_s27, 3  ;;  %v2042_v31 = vld [vmem:[%s2317_s6 + $0x8] sm:$0xff]   ;;  %s2633_s22 = scalar_lea.vmem %s2657_s5, %s1722_s28 }
  0x21   : > { %605 = vmatprep.subr.bf16.mxu0 %v2010_v1  ;;  %1966 = vmatprep.subr.bf16.mxu1 %v2010_v1  ;;  %v2013_v3 = vld [vmem:[%s2322_s10 + $0x24] ss:$16 sps:$4 sm:$0xff]   ;;  %v2015_v4 = vld [vmem:[%s2322_s10 + $0x20] ss:$16 sps:$4 sm:$0xff]   ;;  %s2341_s14 = scalar_lea.vmem %s2654_s2, %s1724_s11  ;;  %v2038_v21 = vld [vmem:[%s2322_s10 + $0xc] ss:$16 sps:$4 sm:$0xff]  }
  0x22   : > { %606 = vmatpush1.bf16.msra.mxu0 %v2012_v2  ;;  %1974 = vmatpush1.bf16.msra.mxu1 %v2012_v2  ;;  %v2016_v5 = vld [vmem:[%s2322_s10 + $0x44] ss:$16 sps:$4 sm:$0xff]   ;;  %v2018_v6 = vld [vmem:[%s2322_s10 + $0x40] ss:$16 sps:$4 sm:$0xff]   ;;  %v1088_v18 = vld [vmem:[%s2341_s14 + $0x8] sm:$0xff]  ;;  %p312_p11 = scmp.lt.s32.totalorder %s310_s15, 7 }
  0x23   : > { %607 = vmatprep.subr.bf16.mxu0 %v2013_v3  ;;  %1967 = vmatprep.subr.bf16.mxu1 %v2013_v3  ;;  %v2019_v7 = vld [vmem:[%s2322_s10 + $0x64] ss:$16 sps:$4 sm:$0xff]   ;;  %v2021_v8 = vld [vmem:[%s2322_s10 + $0x60] ss:$16 sps:$4 sm:$0xff]   ;;  %v1090_v20 = vld [vmem:[%s2341_s14 + $0x18] sm:$0xff] }
  0x24   : > { %v2022_v9 = vld [vmem:[%s2322_s10 + $0x84] ss:$16 sps:$4 sm:$0xff]   ;;  %v2024_v10 = vld [vmem:[%s2322_s10 + $0x80] ss:$16 sps:$4 sm:$0xff]   ;;  %v2036_v25 = vld [vmem:[%s2322_s10 + $0x8] ss:$16 sps:$4 sm:$0xff]  }
  0x25   : > { %v2025_v11 = vld [vmem:[%s2322_s10 + $0xa4] ss:$16 sps:$4 sm:$0xff]   ;;  %v2027_v12 = vld [vmem:[%s2322_s10 + $0xa0] ss:$16 sps:$4 sm:$0xff]   ;;  %v2041_v26 = vld [vmem:[%s2322_s10 + $0x2c] ss:$16 sps:$4 sm:$0xff]  }
  0x26   : > { %608 = vmatpush1.bf16.msra.mxu0 %v2015_v4  ;;  %1975 = vmatpush1.bf16.msra.mxu1 %v2015_v4  ;;  %v2028_v13 = vld [vmem:[%s2322_s10 + $0xc4] ss:$16 sps:$4 sm:$0xff]   ;;  %v2030_v14 = vld [vmem:[%s2322_s10 + $0xc0] ss:$16 sps:$4 sm:$0xff]   ;;  %v1092_v28 = vld [vmem:[%s2341_s14 + $0x28] sm:$0xff]  ;;  %s2668_s15 = smov (!%p312_p11, %s310_s15), 7 }
  0x27   : > { %609 = vmatprep.subr.bf16.mxu0 %v2016_v5  ;;  %1968 = vmatprep.subr.bf16.mxu1 %v2016_v5  ;;  %v2031_v15 = vld [vmem:[%s2322_s10 + $0xe4] ss:$16 sps:$4 sm:$0xff]   ;;  %v2033_v19 = vld [vmem:[%s2322_s10 + $0xe0] ss:$16 sps:$4 sm:$0xff]   ;;  %v2039_v29 = vld [vmem:[%s2322_s10 + $0x28] ss:$16 sps:$4 sm:$0xff]  }
  0x28   : > { %v1087_v16 = vld [vmem:[%s2341_s14] sm:$0xff]  ;;  %v1089_v17 = vld [vmem:[%s2341_s14 + $0x10] sm:$0xff]  ;;  %v2046_v30 = vld [vmem:[%s2322_s10 + $0x4c] ss:$16 sps:$4 sm:$0xff]   ;;  %s1838_s16 = sshll.u32 %s2668_s15, 7 }
  0x29   : > { %1105 = vperm.xlu0 %2008, %v1087_v16   ;;  %1115 = vperm.xlu1 %2009, %v1089_v17   ;;  %v2352_v22 = vld [vmem:[%s2317_s6] sm:$0xff]   ;;  %v1093_v27 = vld [vmem:[%s2341_s14 + $0x30] sm:$0xff]  ;;  %v2370_v32 = vld [vmem:[%s2317_s6 + $0x28] sm:$0xff]   ;;  %s319_s19 = scalar_lea.vmem %s2656_s4, %s1838_s16 }
  0x2a   : > { %610 = vmatpush1.bf16.msra.mxu0 %v2018_v6  ;;  %1976 = vmatpush1.bf16.msra.mxu1 %v2018_v6  ;;  %v2355_v23 = vld [vmem:[%s2317_s6 + $0x20] sm:$0xff]   ;;  %v1094_v34 = vld [vmem:[%s2341_s14 + $0x38] sm:$0xff]  ;;  %v1097_v37 = vld [vmem:[%s2341_s14 + $0x50] sm:$0xff] }
  0x2b   : > { %611 = vmatprep.subr.bf16.mxu0 %v2019_v7  ;;  %1969 = vmatprep.subr.bf16.mxu1 %v2019_v7  ;;  %v1091_v24 = vld [vmem:[%s2341_s14 + $0x20] sm:$0xff]  ;;  %v2044_v35 = vld [vmem:[%s2322_s10 + $0x48] ss:$16 sps:$4 sm:$0xff]   ;;  %v2049_v36 = vld [vmem:[%s2322_s10 + $0x6c] ss:$16 sps:$4 sm:$0xff]  }
  0x2c   : > { %v1095_v33 = vld [vmem:[%s2341_s14 + $0x40] sm:$0xff]  ;;  %v1096_v38 = vld [vmem:[%s2341_s14 + $0x48] sm:$0xff]  ;;  %v2050_v41 = vld [vmem:[%s2317_s6 + $0x10] sm:$0xff]  }
  0x2d   : > { %1110 = vperm.xlu0 %2008, %v1088_v18   ;;  %1120 = vperm.xlu1 %2009, %v1090_v20   ;;  %v2047_v39 = vld [vmem:[%s2322_s10 + $0x68] ss:$16 sps:$4 sm:$0xff]   ;;  %v2054_v40 = vld [vmem:[%s2322_s10 + $0x8c] ss:$16 sps:$4 sm:$0xff]   ;;  %v2051_v42 = vld [vmem:[%s2317_s6 + $0x30] sm:$0xff]  }
  0x2e   : > { %612 = vmatpush1.bf16.msra.mxu0 %v2021_v8  ;;  %1977 = vmatpush1.bf16.msra.mxu1 %v2021_v8  ;;  %v1099_v43 = vld [vmem:[%s2341_s14 + $0x60] sm:$0xff]  ;;  %v1098_v44 = vld [vmem:[%s2341_s14 + $0x58] sm:$0xff]  ;;  %v1101_v47 = vld [vmem:[%s2341_s14 + $0x70] sm:$0xff] }
  0x2f   : > { %613 = vmatprep.subr.bf16.mxu0 %v2022_v9  ;;  %1970 = vmatprep.subr.bf16.mxu1 %v2022_v9  ;;  %v2052_v45 = vld [vmem:[%s2322_s10 + $0x88] ss:$16 sps:$4 sm:$0xff]   ;;  %v2057_v46 = vld [vmem:[%s2322_s10 + $0xac] ss:$16 sps:$4 sm:$0xff]   ;;  %v2066_v57 = vld [vmem:[%s319_s19 + $0x40] sm:$0xff]  }
  0x30   : > { %v1100_v48 = vld [vmem:[%s2341_s14 + $0x68] sm:$0xff]  ;;  %v2058_v51 = vld [vmem:[%s2317_s6 + $0x18] sm:$0xff]   ;;  %v2067_v58 = vld [vmem:[%s319_s19] sm:$0xff]  }
  0x31   : > { %1125 = vperm.xlu0 %2008, %v1091_v24   ;;  %1130 = vperm.xlu1 %2009, %v1092_v28   ;;  %v2055_v49 = vld [vmem:[%s2322_s10 + $0xa8] ss:$16 sps:$4 sm:$0xff]   ;;  %v2062_v50 = vld [vmem:[%s2322_s10 + $0xcc] ss:$16 sps:$4 sm:$0xff]   ;;  %v2070_v61 = vld [vmem:[%s319_s19 + $0x50] sm:$0xff]  }
  0x32   : > { %614 = vmatpush1.bf16.msra.mxu0 %v2024_v10  ;;  %1978 = vmatpush1.bf16.msra.mxu1 %v2024_v10  ;;  %v2059_v52 = vld [vmem:[%s2317_s6 + $0x38] sm:$0xff]   ;;  %v2068_v59 = vld [vmem:[%s319_s19 + $0x48] sm:$0xff]   ;;  %v2071_v62 = vld [vmem:[%s319_s19 + $0x10] sm:$0xff]  }
  0x33   : > { %615 = vmatprep.subr.bf16.mxu0 %v2025_v11  ;;  %1971 = vmatprep.subr.bf16.mxu1 %v2025_v11  ;;  %v1102_v53 = vld [vmem:[%s2341_s14 + $0x78] sm:$0xff]  ;;  %v2069_v60 = vld [vmem:[%s319_s19 + $0x8] sm:$0xff]   ;;  %v2074_v1 = vld [vmem:[%s319_s19 + $0x60] sm:$0xff]  }
  0x34   : > { %v2060_v54 = vld [vmem:[%s2322_s10 + $0xc8] ss:$16 sps:$4 sm:$0xff]   ;;  %v2065_v55 = vld [vmem:[%s2322_s10 + $0xec] ss:$16 sps:$4 sm:$0xff]   ;;  %v2075_v2 = vld [vmem:[%s319_s19 + $0x20] sm:$0xff]  }
  0x35   : > { %1135 = vperm.xlu0 %2008, %v1093_v27   ;;  %1140 = vperm.xlu1 %2009, %v1094_v34   ;;  %v2063_v56 = vld [vmem:[%s2322_s10 + $0xe8] ss:$16 sps:$4 sm:$0xff]   ;;  %v2078_v5 = vld [vmem:[%s319_s19 + $0x70] sm:$0xff]  }
  0x36   : > { %616 = vmatpush1.bf16.msra.mxu0 %v2027_v12  ;;  %1979 = vmatpush1.bf16.msra.mxu1 %v2027_v12  ;;  %v2072_v63 = vld [vmem:[%s319_s19 + $0x58] sm:$0xff]   ;;  %v2076_v3 = vld [vmem:[%s319_s19 + $0x68] sm:$0xff]   ;;  %v2079_v6 = vld [vmem:[%s319_s19 + $0x30] sm:$0xff]  }
  0x37   : > { %617 = vmatprep.subr.bf16.mxu0 %v2028_v13  ;;  %1972 = vmatprep.subr.bf16.mxu1 %v2028_v13  ;;  %v2077_v4 = vld [vmem:[%s319_s19 + $0x28] sm:$0xff]   ;;  %v2080_v7 = vld [vmem:[%s319_s19 + $0x78] sm:$0xff]  }
  0x38   : > { %v2081_v8 = vld [vmem:[%s319_s19 + $0x38] sm:$0xff]  }
  0x39   : > { %1145 = vperm.xlu0 %2008, %v1095_v33   ;;  %1150 = vperm.xlu1 %2009, %v1096_v38  }
  0x3a   : > { %618 = vmatpush1.bf16.msra.mxu0 %v2030_v14  ;;  %1980 = vmatpush1.bf16.msra.mxu1 %v2030_v14 }
  0x3b   : > { %619 = vmatprep.subr.bf16.mxu0 %v2031_v15  ;;  %1973 = vmatprep.subr.bf16.mxu1 %v2031_v15 }
  0x3d   : > { %1155 = vperm.xlu0 %2008, %v1097_v37   ;;  %1160 = vperm.xlu1 %2009, %v1098_v44  }
  0x3e   : > { %620 = vmatpush1.bf16.msra.mxu0 %v2033_v19  ;;  %1981 = vmatpush1.bf16.msra.mxu1 %v2033_v19 }
  0x3f   : > { %718 = vmatprep.subr.bf16.mxu1 %v2038_v21  ;;  %1902 = vmatprep.subr.bf16.mxu0 %v2066_v57 }
  0x41   : > { %638 = vmatmul.mubr.bf16.vlgmr.msra.gmra.mrb[0].mxu0 %v2352_v22  ;;  %678 = vmatmul.mubr.bf16.vlgmr.msra.gmra.mrb[0].mxu1 %v2355_v23 }
  0x42   : > { %719 = vmatpush1.bf16.msra.mxu1 %v2036_v25  ;;  %647 = vmatprep.mubr.bf16.mxu0 %v2249_v0 }
  0x43   : > { %720 = vmatprep.subr.bf16.mxu1 %v2041_v26  ;;  %687 = vmatprep.mubr.bf16.mxu1 %v2249_v0 }
  0x44   : > { %1165 = vperm.xlu0 %2008, %v1099_v43   ;;  %1170 = vperm.xlu1 %2009, %v1100_v48  }
  0x45   : > { %1903 = vmatpush3.bf16.msra.mxu0 %v2067_v58 }
  0x46   : > { %721 = vmatpush1.bf16.msra.mxu1 %v2039_v29  ;;  %1904 = vmatprep.subr.bf16.mxu0 %v2068_v59 }
  0x47   : > { %722 = vmatprep.subr.bf16.mxu1 %v2046_v30 }
  0x48   : > { %1175 = vperm.xlu0 %2008, %v1101_v47   ;;  %1180 = vperm.xlu1 %2009, %v1102_v53  }
  0x49   : > { %648 = vmatmul.mubr.bf16.gmra.mrb[4].mxu0 %v2042_v31  ;;  %688 = vmatmul.mubr.bf16.gmra.mrb[4].mxu1 %v2370_v32 }
  0x4a   : > { %723 = vmatpush1.bf16.msra.mxu1 %v2044_v35  ;;  %657 = vmatprep.mubr.bf16.mxu0 %v2249_v0 }
  0x4b   : > { %724 = vmatprep.subr.bf16.mxu1 %v2049_v36  ;;  %697 = vmatprep.mubr.bf16.mxu1 %v2249_v0 }
  0x4c   : > { %1905 = vmatpush3.bf16.msra.mxu0 %v2069_v60 }
  0x4d   : > { %1906 = vmatprep.subr.bf16.mxu0 %v2070_v61 }
  0x4e   : > { %725 = vmatpush1.bf16.msra.mxu1 %v2047_v39 }
  0x4f   : > { %726 = vmatprep.subr.bf16.mxu1 %v2054_v40 }
  0x50   : > { %1907 = vmatpush3.bf16.msra.mxu0 %v2071_v62 }
  0x51   : > { %658 = vmatmul.mubr.bf16.gmra.mrb[8].mxu0 %v2050_v41  ;;  %698 = vmatmul.mubr.bf16.gmra.mrb[8].mxu1 %v2051_v42 }
  0x52   : > { %727 = vmatpush1.bf16.msra.mxu1 %v2052_v45  ;;  %667 = vmatprep.mubr.bf16.mxu0 %v2249_v0 }
  0x53   : > { %728 = vmatprep.subr.bf16.mxu1 %v2057_v46  ;;  %707 = vmatprep.mubr.bf16.mxu1 %v2249_v0 }
  0x54   : > { %1908 = vmatprep.subr.bf16.mxu0 %v2072_v63 }
  0x56   : > { %729 = vmatpush1.bf16.msra.mxu1 %v2055_v49 }
  0x57   : > { %730 = vmatprep.subr.bf16.mxu1 %v2062_v50 }
  0x59   : > { %668 = vmatmul.mubr.bf16.gmra.mrb[12].mxu0 %v2058_v51  ;;  %708 = vmatmul.mubr.bf16.gmra.mrb[12].mxu1 %v2059_v52 }
  0x5a   : > { %731 = vmatpush1.bf16.msra.mxu1 %v2060_v54  ;;  %750 = vmatprep.mubr.bf16.mxu1 %v2249_v0 }
  0x5b   : > { %732 = vmatprep.subr.bf16.mxu1 %v2065_v55 }
  0x5e   : > { %733 = vmatpush1.bf16.msra.mxu1 %v2063_v56 }
  0x61   : > { %751 = vmatmul.mubr.bf16.vlgmr.msra.gmra.mrb[16].mxu1 %v2352_v22 }
  0x62   : > { %760 = vmatprep.mubr.bf16.mxu1 %v2249_v0 }
  0x69   : > { %761 = vmatmul.mubr.bf16.gmra.mrb[20].mxu1 %v2042_v31 }
  0x6a   : > { %770 = vmatprep.mubr.bf16.mxu1 %v2249_v0 }
  0x71   : > { %771 = vmatmul.mubr.bf16.gmra.mrb[24].mxu1 %v2050_v41 }
  0x72   : > { %780 = vmatprep.mubr.bf16.mxu1 %v2249_v0 }
  0x79   : > { %781 = vmatmul.mubr.bf16.gmra.mrb[28].mxu1 %v2058_v51 }
  0x7a   : > { %790 = vmatprep.mubr.bf16.mxu1 %v2249_v0 }
  0x81   : > { %791 = vmatmul.mubr.bf16.gmra.mrb[32].mxu1 %v2355_v23 }
  0x82   : > { %800 = vmatprep.mubr.bf16.mxu1 %v2249_v0 }
  0x89   : > { %801 = vmatmul.mubr.bf16.gmra.mrb[36].mxu1 %v2370_v32 }
  0x8a   : > { %810 = vmatprep.mubr.bf16.mxu1 %v2249_v0 }
  0x91   : > { %811 = vmatmul.mubr.bf16.gmra.mrb[40].mxu1 %v2051_v42 }
  0x92   : > { %820 = vmatprep.mubr.bf16.mxu1 %v2249_v0  ;;  %v2073_v0 = vld [vmem:[%s319_s19 + $0x18] sm:$0xff]  }
  0x93   : > { %1909 = vmatpush3.bf16.msra.mxu0 %v2073_v0 }
  0x94   : > { %1910 = vmatprep.subr.bf16.mxu0 %v2074_v1 }
  0x97   : > { %1911 = vmatpush3.bf16.msra.mxu0 %v2075_v2 }
  0x98   : > { %1912 = vmatprep.subr.bf16.mxu0 %v2076_v3 }
  0x99   : > { %821 = vmatmul.mubr.bf16.gmra.mrb[44].mxu1 %v2059_v52 }
  0x9b   : > { %1913 = vmatpush3.bf16.msra.mxu0 %v2077_v4 }
  0x9c   : > { %1914 = vmatprep.subr.bf16.mxu0 %v2078_v5 }
  0x9f   : > { %1915 = vmatpush3.bf16.msra.mxu0 %v2079_v6 }
  0xa0   : > { %1916 = vmatprep.subr.bf16.mxu0 %v2080_v7 }
  0xa3   : > { %1917 = vmatpush3.bf16.msra.mxu0 %v2081_v8 }
 0x114   : > { %v2416_v9 = vpop.f32.mrb[0].mxu0  ;;  %v2418_v10 = vpop.f32.mrb[0].mxu1 }
 0x115   : > { %v1771_v11 = vmul.f32 -1.442695, %v2416_v9  ;;  %v2421_v12 = vpop.f32.mrb[1].mxu0  ;;  %v2423_v13 = vpop.f32.mrb[1].mxu1  ;;  %v1787_v21 = vmul.f32 -1.442695, %v2418_v10 }
 0x116   : > { %v1772_v14 = vmul.f32 -1.442695, %v2421_v12  ;;  %v2426_v15 = vpop.f32.mrb[2].mxu0  ;;  %v2428_v16 = vpop.f32.mrb[2].mxu1  ;;  %v1788_v27 = vmul.f32 -1.442695, %v2423_v13 }
 0x117   : > { %2082 = vpow2.f32 %v1771_v11  ;;  %v1773_v17 = vmul.f32 -1.442695, %v2426_v15  ;;  %v2431_v18 = vpop.f32.mrb[3].mxu0  ;;  %v2433_v19 = vpop.f32.mrb[3].mxu1  ;;  %v1789_v34 = vmul.f32 -1.442695, %v2428_v16 }
 0x118   : > { %2084 = vpow2.f32 %v1772_v14  ;;  %v1774_v20 = vmul.f32 -1.442695, %v2431_v18  ;;  %v1790_v36 = vmul.f32 -1.442695, %v2433_v19 }
 0x119   : > { %2086 = vpow2.f32 %v1773_v17 }
 0x11a   : > { %2088 = vpow2.f32 %v1774_v20 }
 0x11c   : > { %v2437_v22 = vpop.f32.mrb[4].mxu0  ;;  %v2439_v23 = vpop.f32.mrb[4].mxu1 }
 0x11d   : > { %v1775_v24 = vmul.f32 -1.442695, %v2437_v22  ;;  %v2442_v25 = vpop.f32.mrb[5].mxu0  ;;  %v2444_v26 = vpop.f32.mrb[5].mxu1  ;;  %v1791_v43 = vmul.f32 -1.442695, %v2439_v23 }
 0x11e   : > { %v1776_v28 = vmul.f32 -1.442695, %v2442_v25  ;;  %v2448_v29 = vpop.f32.mrb[6].mxu0  ;;  %v2450_v30 = vpop.f32.mrb[6].mxu1  ;;  %v1792_v51 = vmul.f32 -1.442695, %v2444_v26 }
 0x11f   : > { %2090 = vpow2.f32 %v1775_v24  ;;  %v1777_v31 = vmul.f32 -1.442695, %v2448_v29  ;;  %v2453_v32 = vpop.f32.mrb[7].mxu0  ;;  %v2455_v33 = vpop.f32.mrb[7].mxu1 }
 0x120   : > { %2092 = vpow2.f32 %v1787_v21  ;;  %v1778_v3 = vmul.f32 -1.442695, %v2453_v32 }
 0x121   : > { %v2083_v35 = vpop.eup %2082  ;;  %2094 = vpow2.f32 %v1776_v28  ;;  %v1106_v28 = vpop.permute.xlu0 %1105 }
 0x122   : > { %v927_v37 = vadd.f32 1.0, %v2083_v35  ;;  %2096 = vpow2.f32 %v1788_v27  ;;  %v2085_v38 = vpop.eup %2084 }
 0x123   : > { %2098 = vpow2.f32 %v1777_v31  ;;  %v928_v39 = vadd.f32 1.0, %v2085_v38  ;;  %v2087_v42 = vpop.eup %2086 }
 0x124   : > { %2100 = vpow2.f32 %v1789_v34  ;;  %v2459_v40 = vpop.f32.mrb[8].mxu0  ;;  %v2461_v41 = vpop.f32.mrb[8].mxu1  ;;  %v929_v45 = vadd.f32 1.0, %v2087_v42 }
 0x125   : > { %2102 = vpow2.f32 %v1790_v36  ;;  %v2464_v44 = vpop.f32.mrb[9].mxu0  ;;  %v2466_v46 = vpop.f32.mrb[9].mxu1  ;;  %v1779_v17 = vmul.f32 -1.442695, %v2459_v40 }
 0x126   : > { %2104 = vrcp.f32 %v927_v37  ;;  %v2468_v47 = vpop.f32.mrb[10].mxu0  ;;  %v2089_v48 = vpop.eup %2088  ;;  %v1780_v31 = vmul.f32 -1.442695, %v2464_v44 }
 0x127   : > { %2106 = vrcp.f32 %v928_v39  ;;  %v2470_v49 = vpop.f32.mrb[10].mxu1  ;;  %v930_v50 = vadd.f32 1.0, %v2089_v48  ;;  %v2473_v52 = vpop.f32.mrb[11].mxu0  ;;  %v1781_v39 = vmul.f32 -1.442695, %v2468_v47 }
 0x128   : > { %2108 = vrcp.f32 %v929_v45  ;;  %v2475_v53 = vpop.f32.mrb[11].mxu1  ;;  %v1793_v45 = vmul.f32 -1.442695, %v2450_v30 }
 0x129   : > { %v2091_v54 = vpop.eup %2090  ;;  %2110 = vpow2.f32 %v1791_v43 }
 0x12a   : > { %v2093_v55 = vpop.eup %2092  ;;  %2112 = vrcp.f32 %v930_v50  ;;  %v931_v56 = vadd.f32 1.0, %v2091_v54 }
 0x12b   : > { %v2095_v57 = vpop.eup %2094  ;;  %2114 = vpow2.f32 %v1792_v51  ;;  %v943_v63 = vadd.f32 1.0, %v2093_v55 }
 0x12c   : > { %v2097_v58 = vpop.eup %2096  ;;  %v932_v59 = vadd.f32 1.0, %v2095_v57  ;;  %v2477_v60 = vpop.f32.mrb[12].mxu0  ;;  %2116 = vrcp.f32 %v931_v56 }
 0x12d   : > { %v2479_v61 = vpop.f32.mrb[12].mxu1  ;;  %v2099_v62 = vpop.eup %2098  ;;  %v944_v7 = vadd.f32 1.0, %v2097_v58 }
 0x12e   : > { %v2481_v0 = vpop.f32.mrb[13].mxu0  ;;  %v2101_v1 = vpop.eup %2100  ;;  %v933_v2 = vadd.f32 1.0, %v2099_v62  ;;  %2118 = vrcp.f32 %v932_v59 }
 0x12f   : > { %v2484_v4 = vpop.f32.mrb[13].mxu1  ;;  %v2486_v5 = vpop.f32.mrb[14].mxu0  ;;  %v945_v24 = vadd.f32 1.0, %v2101_v1 }
 0x130   : > { %v2103_v6 = vpop.eup %2102  ;;  %v2488_v8 = vpop.f32.mrb[14].mxu1  ;;  %2120 = vrcp.f32 %v933_v2 }
 0x131   : > { %v2490_v11 = vpop.f32.mrb[15].mxu0  ;;  %v2105_v14 = vpop.eup %2104  ;;  %2122 = vrcp.f32 %v943_v63  ;;  %v946_v36 = vadd.f32 1.0, %v2103_v6 }
 0x132   : > { %v2493_v20 = vpop.f32.mrb[15].mxu1  ;;  %v2107_v21 = vpop.eup %2106  ;;  %2124 = vpow2.f32 %v1778_v3  ;;  %v1023_v35 = vmul.f32 %v2105_v14, %v2416_v9  ;;  %v1782_v9 = vmul.f32 -1.442695, %v2473_v52 }
 0x133   : > { %v2109_v27 = vpop.eup %2108  ;;  %2126 = vrcp.f32 %v944_v7  ;;  %v1024_v38 = vmul.f32 %v2107_v21, %v2421_v12  ;;  %v1111_v62 = vpop.permute.xlu0 %1110  ;;  %v1794_v7 = vmul.f32 -1.442695, %v2455_v33 }
 0x134   : > { %v2111_v34 = vpop.eup %2110  ;;  %2128 = vpow2.f32 %v1779_v17  ;;  %v752_v42 = vpop.f32.mrb[16].mxu1  ;;  %v1025_v43 = vmul.f32 %v2109_v27, %v2426_v15  ;;  %v1783_v15 = vmul.f32 -1.442695, %v2477_v60 }
 0x135   : > { %v2113_v37 = vpop.eup %2112  ;;  %2130 = vrcp.f32 %v945_v24  ;;  %v1055_v48 = vmul.f32 %v1023_v35, %v752_v42  ;;  %v754_v50 = vpop.f32.mrb[17].mxu1  ;;  %v947_v12 = vadd.f32 1.0, %v2111_v34 }
 0x136   : > { %v2115_v51 = vpop.eup %2114  ;;  %v1026_v54 = vmul.f32 %v2113_v37, %v2431_v18  ;;  %2132 = vpow2.f32 %v1780_v31  ;;  %v1056_v55 = vmul.f32 %v1024_v38, %v754_v50  ;;  %v756_v56 = vpop.f32.mrb[18].mxu1 }
 0x137   : > { %2134 = vrcp.f32 %v946_v36  ;;  %v1057_v57 = vmul.f32 %v1025_v43, %v756_v56  ;;  %v758_v58 = vpop.f32.mrb[19].mxu1  ;;  %v2117_v59 = vpop.eup %2116  ;;  %v948_v2 = vadd.f32 1.0, %v2115_v51  ;;  %v1183_v3 = vmul.f32 %v1106_v28, %v1055_v48 }
 0x138   : > { %2136 = vpow2.f32 %v1781_v39  ;;  %v1058_v63 = vmul.f32 %v1026_v54, %v758_v58  ;;  %v2119_v1 = vpop.eup %2118  ;;  %v2505_v14 = vpop.permute.xlu1 %1115  ;;  %v1184_v17 = vmul.f32 %v1106_v28, %v1056_v55  ;;  %v1027_v27 = vmul.f32 %v2117_v59, %v2437_v22 }
 0x139   : > { %2138 = vpow2.f32 %v1793_v45  ;;  %v1185_v18 = vmul.f32 %v1111_v62, %v1057_v57  ;;  %v1028_v35 = vmul.f32 %v2119_v1, %v2442_v25  ;;  %v1795_v36 = vmul.f32 -1.442695, %v2461_v41 }
 0x13a   : > { %v2121_v6 = vpop.eup %2120  ;;  %2140 = vpow2.f32 %v1782_v9  ;;  %v1186_v21 = vmul.f32 %v1111_v62, %v1058_v63  ;;  %v1796_v22 = vmul.f32 -1.442695, %v2466_v46  ;;  %v1798_v63 = vmul.f32 -1.442695, %v2475_v53 }
 0x13b   : > { %v2507_v24 = vpop.eup %2122  ;;  %2142 = vrcp.f32 %v947_v12  ;;  %v1231_v31 = vpack.c.bf16 %v1185_v18, %v1183_v3  ;;  %v1029_v28 = vmul.f32 %v2121_v6, %v2448_v29  ;;  %v1797_v12 = vmul.f32 -1.442695, %v2470_v49 }
 0x13c   : > { %v2125_v34 = vpop.eup %2124  ;;  %2144 = vpow2.f32 %v1783_v15  ;;  %v762_v37 = vpop.f32.mrb[20].mxu1  ;;  %v1232_v38 = vpack.c.bf16 %v1186_v21, %v1184_v17  ;;  %v1799_v6 = vmul.f32 -1.442695, %v2479_v61 }
 0x13d   : > { %v2512_v39 = vpop.eup %2126  ;;  %2146 = vrcp.f32 %v948_v2  ;;  %v934_v42 = vadd.f32 1.0, %v2125_v34  ;;  %v1059_v43 = vmul.f32 %v1027_v27, %v762_v37  ;;  %v764_v45 = vpop.f32.mrb[21].mxu1 }
 0x13e   : > { %v2129_v48 = vpop.eup %2128  ;;  %2148 = vpow2.f32 %v1794_v7  ;;  %v2516_v50 = vmul.f32 %v1028_v35, %v764_v45  ;;  %v766_v25 = vpop.f32.mrb[22].mxu1  ;;  %1407 = vmatprep.mubr.bf16.mxu0 %v1232_v38  ;;  %v1784_v38 = vmul.f32 -1.442695, %v2481_v0 }
 0x13f   : > { %v2518_v51 = vpop.eup %2130  ;;  %2150 = vrcp.f32 %v934_v42  ;;  %v935_v54 = vadd.f32 1.0, %v2129_v48  ;;  %v1061_v9 = vmul.f32 %v1029_v28, %v766_v25  ;;  %v768_v55 = vpop.f32.mrb[23].mxu1  ;;  %1408 = vmatmul.mubr.bf16.vlgmr.msra.gmra.mrb[16].mxu0 %v1231_v31  ;;  %v2524_v59 = vmul.f32 %v2505_v14, %v1059_v43 }
 0x140   : > { %v2133_v56 = vpop.eup %2132  ;;  %2152 = vpow2.f32 %v1795_v36  ;;  %v1121_v29 = vpop.permute.xlu1 %1120  ;;  %v1800_v43 = vmul.f32 -1.442695, %v2484_v4  ;;  %v1785_v48 = vmul.f32 -1.442695, %v2486_v5 }
 0x141   : > { %v2521_v57 = vpop.eup %2134  ;;  %2154 = vrcp.f32 %v935_v54  ;;  %v936_v58 = vadd.f32 1.0, %v2133_v56  ;;  %v2526_v62 = vmul.f32 %v1121_v29, %v1061_v9  ;;  %v1801_v54 = vmul.f32 -1.442695, %v2488_v8  ;;  %v1126_v56 = vpop.permute.xlu0 %1125 }
 0x142   : > { %v2137_v15 = vpop.eup %2136  ;;  %2156 = vpow2.f32 %v1796_v22 }
 0x143   : > { %v2139_v1 = vpop.eup %2138  ;;  %2158 = vrcp.f32 %v936_v58  ;;  %v937_v2 = vadd.f32 1.0, %v2137_v15 }
 0x144   : > { %v2141_v18 = vpop.eup %2140  ;;  %2160 = vpow2.f32 %v1797_v12  ;;  %v772_v7 = vpop.f32.mrb[24].mxu1  ;;  %v949_v34 = vadd.f32 1.0, %v2139_v1  ;;  %v1786_v12 = vmul.f32 -1.442695, %v2490_v11  ;;  %v1802_v1 = vmul.f32 -1.442695, %v2493_v20 }
 0x145   : > { %v2532_v17 = vpop.eup %2142  ;;  %2162 = vrcp.f32 %v937_v2  ;;  %v938_v21 = vadd.f32 1.0, %v2141_v18  ;;  %v774_v27 = vpop.f32.mrb[25].mxu1 }
 0x146   : > { %v2145_v31 = vpop.eup %2144  ;;  %2164 = vpow2.f32 %v1798_v63  ;;  %v776_v35 = vpop.f32.mrb[26].mxu1 }
 0x147   : > { %v2534_v36 = vpop.eup %2146  ;;  %2166 = vrcp.f32 %v938_v21  ;;  %v939_v37 = vadd.f32 1.0, %v2145_v31  ;;  %v778_v28 = vpop.f32.mrb[27].mxu1 }
 0x148   : > { %v2149_v42 = vpop.eup %2148  ;;  %2168 = vpow2.f32 %v1799_v6  ;;  %v1131_v63 = vpop.permute.xlu1 %1130 }
 0x149   : > { %v2151_v45 = vpop.eup %2150  ;;  %2170 = vrcp.f32 %v939_v37  ;;  %v950_v21 = vadd.f32 1.0, %v2149_v42 }
 0x14a   : > { %v2153_v22 = vpop.eup %2152  ;;  %2172 = vrcp.f32 %v949_v34  ;;  %v1030_v25 = vmul.f32 %v2151_v45, %v2453_v32 }
 0x14b   : > { %v2155_v9 = vpop.eup %2154  ;;  %2174 = vpow2.f32 %v1784_v38 }
 0x14c   : > { %v2157_v58 = vpop.eup %2156  ;;  %v1031_v15 = vmul.f32 %v2155_v9, %v2459_v40  ;;  %2176 = vpow2.f32 %v1800_v43  ;;  %v1062_v2 = vmul.f32 %v1030_v25, %v768_v55  ;;  %v782_v18 = vpop.f32.mrb[28].mxu1  ;;  %v951_v9 = vadd.f32 1.0, %v2153_v22 }
 0x14d   : > { %v2159_v6 = vpop.eup %2158  ;;  %2178 = vpow2.f32 %v1785_v48  ;;  %v2544_v32 = vpop.f32.mrb[29].mxu1  ;;  %v1188_v55 = vmul.f32 %v2505_v14, %v2516_v50 }
 0x14e   : > { %v2161_v31 = vpop.eup %2160  ;;  %v1032_v34 = vmul.f32 %v2159_v6, %v2464_v44  ;;  %2180 = vpow2.f32 %v1801_v54  ;;  %v1190_v37 = vmul.f32 %v1121_v29, %v1062_v2  ;;  %v1063_v38 = vmul.f32 %v1031_v15, %v772_v7  ;;  %v2547_v45 = vpop.f32.mrb[30].mxu1 }
 0x14f   : > { %v2163_v40 = vpop.eup %2162  ;;  %2182 = vpow2.f32 %v1786_v12  ;;  %v2551_v43 = vpop.f32.mrb[31].mxu1  ;;  %v952_v44 = vadd.f32 1.0, %v2157_v58  ;;  %v1039_v54 = vmul.f32 %v2507_v24, %v2418_v10  ;;  %v953_v58 = vadd.f32 1.0, %v2161_v31 }
 0x150   : > { %v2165_v42 = vpop.eup %2164  ;;  %v1033_v48 = vmul.f32 %v2163_v40, %v2468_v47  ;;  %2184 = vpow2.f32 %v1802_v1  ;;  %v1064_v25 = vmul.f32 %v1032_v34, %v774_v27  ;;  %v1234_v29 = vpack.c.bf16 %v1190_v37, %v1188_v55  ;;  %v2556_v22 = vpop.permute.xlu0 %1135 }
 0x151   : > { %v2167_v3 = vpop.eup %2166  ;;  %2186 = vrcp.f32 %v950_v21  ;;  %v2559_v14 = vpop.permute.xlu1 %1140  ;;  %v1040_v47 = vmul.f32 %v2512_v39, %v2423_v13  ;;  %v1041_v27 = vmul.f32 %v2518_v51, %v2428_v16  ;;  %v1191_v24 = vmul.f32 %v1126_v56, %v1063_v38 }
 0x152   : > { %v2169_v7 = vpop.eup %2168  ;;  %v1034_v12 = vmul.f32 %v2167_v3, %v2473_v52  ;;  %v1065_v50 = vmul.f32 %v1033_v48, %v776_v35  ;;  %2188 = vrcp.f32 %v951_v9  ;;  %1415 = vmatprep.mubr.bf16.mxu0 %v1234_v29  ;;  %v2658_v52 = vpack.c.bf16 %v2526_v62, %v2524_v59 }
 0x153   : > { %v2171_v15 = vpop.eup %2170  ;;  %2190 = vrcp.f32 %v952_v44  ;;  %v954_v13 = vadd.f32 1.0, %v2165_v42  ;;  %v1192_v39 = vmul.f32 %v1126_v56, %v1064_v25  ;;  %v1042_v55 = vmul.f32 %v2521_v57, %v2433_v19 }
 0x154   : > { %v2173_v1 = vpop.eup %2172  ;;  %v1035_v10 = vmul.f32 %v2171_v15, %v2477_v60  ;;  %v1193_v2 = vmul.f32 %v1131_v63, %v1065_v50  ;;  %v1066_v6 = vmul.f32 %v1034_v12, %v778_v28  ;;  %1416 = vmatmul.mubr.bf16.gmra.mrb[20].mxu0 %v2658_v52  ;;  %v792_v3 = vpop.f32.mrb[32].mxu1  ;;  %2192 = vrcp.f32 %v953_v58 }
 0x155   : > { %v2175_v35 = vpop.eup %2174  ;;  %v1071_v21 = vmul.f32 %v1039_v54, %v792_v3  ;;  %v794_v16 = vpop.f32.mrb[33].mxu1  ;;  %v955_v54 = vadd.f32 1.0, %v2169_v7  ;;  %v1043_v19 = vmul.f32 %v2532_v17, %v2439_v23  ;;  %v1044_v57 = vmul.f32 %v2534_v36, %v2444_v26 }
 0x156   : > { %v2177_v51 = vpop.eup %2176  ;;  %v940_v31 = vadd.f32 1.0, %v2175_v35  ;;  %v1194_v34 = vmul.f32 %v1131_v63, %v1066_v6  ;;  %v2569_v37 = vmul.f32 %v1035_v10, %v782_v18  ;;  %v1235_v60 = vpack.c.bf16 %v1193_v2, %v1191_v24  ;;  %v796_v38 = vpop.f32.mrb[34].mxu1 }
 0x157   : > { %v2179_v40 = vpop.eup %2178  ;;  %v1072_v28 = vmul.f32 %v1040_v47, %v794_v16  ;;  %v1073_v9 = vmul.f32 %v1041_v27, %v796_v38  ;;  %v798_v59 = vpop.f32.mrb[35].mxu1  ;;  %v956_v47 = vadd.f32 1.0, %v2177_v51  ;;  %v1045_v6 = vmul.f32 %v2173_v1, %v2450_v30 }
 0x158   : > { %v2181_v62 = vpop.eup %2180  ;;  %v1146_v42 = vpop.permute.xlu0 %1145  ;;  %2194 = vrcp.f32 %v940_v31  ;;  %v941_v56 = vadd.f32 1.0, %v2179_v40  ;;  %v1236_v25 = vpack.c.bf16 %v1194_v34, %v1192_v39  ;;  %v1074_v50 = vmul.f32 %v1042_v55, %v798_v59 }
 0x159   : > { %v1151_v48 = vpop.permute.xlu1 %1150  ;;  %v2183_v44 = vpop.eup %2182  ;;  %2196 = vrcp.f32 %v954_v13  ;;  %v2573_v63 = vmul.f32 %v1146_v42, %v1071_v21  ;;  %v957_v58 = vadd.f32 1.0, %v2181_v62  ;;  %v2583_v10 = vmul.f32 %v1146_v42, %v1072_v28 }
 0x15a   : > { %v2575_v18 = vmul.f32 %v1151_v48, %v1073_v9  ;;  %v2185_v29 = vpop.eup %2184  ;;  %2198 = vrcp.f32 %v941_v56  ;;  %v942_v12 = vadd.f32 1.0, %v2183_v44  ;;  %1423 = vmatprep.mubr.bf16.mxu0 %v1236_v25  ;;  %v2585_v7 = vmul.f32 %v1151_v48, %v1074_v50 }
 0x15b   : > { %v2187_v15 = vpop.eup %2186  ;;  %v958_v52 = vadd.f32 1.0, %v2185_v29 }
 0x15c   : > { %v1239_v27 = vpack.c.bf16 %v2575_v18, %v2573_v63  ;;  %2200 = vrcp.f32 %v942_v12  ;;  %1424 = vmatmul.mubr.bf16.gmra.mrb[24].mxu0 %v1235_v60  ;;  %v802_v24 = vpop.f32.mrb[36].mxu1  ;;  %v2189_v2 = vpop.eup %2188  ;;  %v1046_v26 = vmul.f32 %v2187_v15, %v2455_v33  ;;  %v1240_v35 = vpack.c.bf16 %v2585_v7, %v2583_v10 }
 0x15d   : > { %v1075_v23 = vmul.f32 %v1043_v19, %v802_v24  ;;  %v804_v17 = vpop.f32.mrb[37].mxu1  ;;  %2202 = vrcp.f32 %v955_v54  ;;  %v2191_v13 = vpop.eup %2190  ;;  %v1047_v28 = vmul.f32 %v2189_v2, %v2461_v41  ;;  %v1195_v2 = vmul.f32 %v2556_v22, %v2569_v37 }
 0x15e   : > { %v1076_v36 = vmul.f32 %v1044_v57, %v804_v17  ;;  %v806_v3 = vpop.f32.mrb[38].mxu1  ;;  %2204 = vrcp.f32 %v956_v47  ;;  %v1156_v16 = vpop.permute.xlu0 %1155  ;;  %v1048_v55 = vmul.f32 %v2191_v13, %v2466_v46 }
 0x15f   : > { %v1077_v39 = vmul.f32 %v1045_v6, %v806_v3  ;;  %v808_v21 = vpop.f32.mrb[39].mxu1  ;;  %2206 = vrcp.f32 %v957_v58  ;;  %v1161_v51 = vpop.permute.xlu1 %1160  ;;  %v2591_v1 = vmul.f32 %v1156_v16, %v1075_v23 }
 0x160   : > { %v1078_v31 = vmul.f32 %v1046_v26, %v808_v21  ;;  %v2193_v30 = vpop.eup %2192  ;;  %2208 = vrcp.f32 %v958_v52  ;;  %v2595_v60 = vmul.f32 %v1156_v16, %v1076_v36 }
 0x161   : > { %v2593_v34 = vmul.f32 %v1161_v51, %v1077_v39  ;;  %v1049_v41 = vmul.f32 %v2193_v30, %v2470_v49 }
 0x162   : > { %v2195_v33 = vpop.eup %2194  ;;  %v2597_v38 = vmul.f32 %v1161_v51, %v1078_v31  ;;  %v1166_v24 = vpop.permute.xlu0 %1165 }
 0x163   : > { %v2197_v40 = vpop.eup %2196  ;;  %v1036_v9 = vmul.f32 %v2195_v33, %v2481_v0  ;;  %v1241_v59 = vpack.c.bf16 %v2593_v34, %v2591_v1 }
 0x164   : > { %v2199_v62 = vpop.eup %2198  ;;  %v812_v42 = vpop.f32.mrb[40].mxu1  ;;  %v1242_v56 = vpack.c.bf16 %v2597_v38, %v2595_v60  ;;  %v1050_v0 = vmul.f32 %v2197_v40, %v2475_v53 }
 0x165   : > { %v1037_v48 = vmul.f32 %v2199_v62, %v2486_v5  ;;  %v1068_v25 = vmul.f32 %v1036_v9, %v2544_v32  ;;  %v1079_v44 = vmul.f32 %v1047_v28, %v812_v42  ;;  %v814_v29 = vpop.f32.mrb[41].mxu1  ;;  %v1171_v32 = vpop.permute.xlu1 %1170 }
 0x166   : > { %v2201_v54 = vpop.eup %2200  ;;  %v1080_v12 = vmul.f32 %v1048_v55, %v814_v29  ;;  %v816_v50 = vpop.f32.mrb[42].mxu1 }
 0x167   : > { %v1038_v15 = vmul.f32 %v2201_v54, %v2490_v11  ;;  %v1069_v46 = vmul.f32 %v1037_v48, %v2547_v45  ;;  %v818_v19 = vpop.f32.mrb[43].mxu1  ;;  %v2203_v57 = vpop.eup %2202  ;;  %v1081_v47 = vmul.f32 %v1049_v41, %v816_v50  ;;  %v1207_v52 = vmul.f32 %v1166_v24, %v1079_v44 }
 0x168   : > { %v1082_v58 = vmul.f32 %v1050_v0, %v818_v19  ;;  %v2205_v5 = vpop.eup %2204  ;;  %v1208_v23 = vmul.f32 %v1166_v24, %v1080_v12  ;;  %v1051_v26 = vmul.f32 %v2203_v57, %v2479_v61  ;;  %v1196_v36 = vmul.f32 %v2556_v22, %v1068_v25  ;;  %v1176_v60 = vpop.permute.xlu0 %1175 }
 0x169   : > { %v1197_v49 = vmul.f32 %v2559_v14, %v1069_v46  ;;  %v1070_v53 = vmul.f32 %v1038_v15, %v2551_v43  ;;  %v2207_v6 = vpop.eup %2206  ;;  %v1209_v11 = vmul.f32 %v1171_v32, %v1081_v47  ;;  %v1052_v39 = vmul.f32 %v2205_v5, %v2484_v4 }
 0x16a   : > { %v1210_v17 = vmul.f32 %v1171_v32, %v1082_v58  ;;  %v2209_v45 = vpop.eup %2208  ;;  %v1053_v43 = vmul.f32 %v2207_v6, %v2488_v8 }
 0x16b   : > { %v1198_v3 = vmul.f32 %v2559_v14, %v1070_v53  ;;  %v1237_v13 = vpack.c.bf16 %v1197_v49, %v1195_v2  ;;  %v1243_v16 = vpack.c.bf16 %v1209_v11, %v1207_v52  ;;  %v1054_v1 = vmul.f32 %v2209_v45, %v2493_v20  ;;  %v1181_v14 = vpop.permute.xlu1 %1180 }
 0x16c   : > { %v822_v37 = vpop.f32.mrb[44].mxu1  ;;  %v1244_v21 = vpack.c.bf16 %v1210_v17, %v1208_v23 }
 0x16d   : > { %v1238_v51 = vpack.c.bf16 %v1198_v3, %v1196_v36  ;;  %v1083_v31 = vmul.f32 %v1051_v26, %v822_v37  ;;  %v824_v30 = vpop.f32.mrb[45].mxu1 }
 0x16e   : > { %v1084_v34 = vmul.f32 %v1052_v39, %v824_v30  ;;  %v826_v33 = vpop.f32.mrb[46].mxu1 }
 0x16f   : > { %1431 = vmatprep.mubr.bf16.mxu0 %v1238_v51  ;;  %v1085_v61 = vmul.f32 %v1053_v43, %v826_v33  ;;  %v828_v22 = vpop.f32.mrb[47].mxu1  ;;  %v1211_v4 = vmul.f32 %v1176_v60, %v1083_v31 }
 0x170   : > { %1432 = vmatmul.mubr.bf16.gmra.mrb[28].mxu0 %v1237_v13  ;;  %v1086_v38 = vmul.f32 %v1054_v1, %v828_v22  ;;  %v1212_v40 = vmul.f32 %v1176_v60, %v1084_v34 }
 0x171   : > { %1439 = vmatprep.mubr.bf16.mxu0 %v1240_v35  ;;  %v1213_v8 = vmul.f32 %v1181_v14, %v1085_v61 }
 0x172   : > { %v1214_v28 = vmul.f32 %v1181_v14, %v1086_v38 }
 0x173   : > { %v1245_v9 = vpack.c.bf16 %v1213_v8, %v1211_v4 }
 0x174   : > { %v1246_v20 = vpack.c.bf16 %v1214_v28, %v1212_v40 }
 0x178   : > { %1440 = vmatmul.mubr.bf16.gmra.mrb[32].mxu0 %v1239_v27 }
 0x179   : > { %1447 = vmatprep.mubr.bf16.mxu0 %v1242_v56 }
 0x180   : > { %1448 = vmatmul.mubr.bf16.gmra.mrb[36].mxu0 %v1241_v59 }
 0x181   : > { %1455 = vmatprep.mubr.bf16.mxu0 %v1244_v21 }
 0x188   : > { %1456 = vmatmul.mubr.bf16.gmra.mrb[40].mxu0 %v1243_v16 }
 0x189   : > { %1463 = vmatprep.mubr.bf16.mxu0 %v1246_v20 }
 0x190   : > { %1464 = vmatmul.mubr.bf16.gmra.mrb[44].mxu0 %v1245_v9 }
 0x212   : > { %v1918_v62 = vpop.f32.mrb[16].mxu0 }
 0x213   : > { %v1919_v10 = vpop.f32.mrb[17].mxu0 }
 0x214   : > { %v1920_v7 = vadd.f32 %v1919_v10, %v1918_v62  ;;  %v1921_v35 = vpop.f32.mrb[18].mxu0 }
 0x215   : > { %v1922_v55 = vpop.f32.mrb[19].mxu0 }
 0x216   : > { %v1923_v42 = vadd.f32 %v1922_v55, %v1921_v35 }
 0x218   : > { %v1858_v63 = vpack.c.bf16 %v1923_v42, %v1920_v7 }
 0x21a   : > { %1859 = vst [vmem:[%s2633_s22] sm:$0xff] %v1858_v63  }
 0x227   : > { %v1924_v18 = vpop.f32.mrb[20].mxu0 }
 0x228   : > { %v1925_v27 = vpop.f32.mrb[21].mxu0 }
 0x229   : > { %v1926_v59 = vadd.f32 %v1925_v27, %v1924_v18  ;;  %v1927_v56 = vpop.f32.mrb[22].mxu0 }
 0x22a   : > { %v1928_v48 = vpop.f32.mrb[23].mxu0 }
 0x22b   : > { %v1929_v25 = vadd.f32 %v1928_v48, %v1927_v56 }
 0x22d   : > { %v1863_v44 = vpack.c.bf16 %v1929_v25, %v1926_v59 }
 0x22f   : > { %1895 = vst [vmem:[%s2633_s22 + $0x8] sm:$0xff] %v1863_v44   ;;  %v1930_v29 = vpop.f32.mrb[24].mxu0 }
 0x230   : > { %v1931_v54 = vpop.f32.mrb[25].mxu0 }
 0x231   : > { %v1932_v41 = vadd.f32 %v1931_v54, %v1930_v29  ;;  %v1933_v0 = vpop.f32.mrb[26].mxu0 }
 0x232   : > { %v1934_v12 = vpop.f32.mrb[27].mxu0 }
 0x233   : > { %v1935_v50 = vadd.f32 %v1934_v12, %v1933_v0 }
 0x235   : > { %v1868_v15 = vpack.c.bf16 %v1935_v50, %v1932_v41 }
 0x237   : > { %1896 = vst [vmem:[%s2633_s22 + $0x10] sm:$0xff] %v1868_v15  }
 0x243   : > { %v1936_v46 = vpop.f32.mrb[28].mxu0 }
 0x244   : > { %v1937_v19 = vpop.f32.mrb[29].mxu0 }
 0x245   : > { %v1938_v57 = vadd.f32 %v1937_v19, %v1936_v46  ;;  %v1939_v47 = vpop.f32.mrb[30].mxu0 }
 0x246   : > { %v1940_v58 = vpop.f32.mrb[31].mxu0 }
 0x247   : > { %v1941_v5 = vadd.f32 %v1940_v58, %v1939_v47 }
 0x249   : > { %v1873_v24 = vpack.c.bf16 %v1941_v5, %v1938_v57 }
 0x24b   : > { %1897 = vst [vmem:[%s2633_s22 + $0x18] sm:$0xff] %v1873_v24   ;;  %v1942_v32 = vpop.f32.mrb[32].mxu0 }
 0x24c   : > { %v1943_v2 = vpop.f32.mrb[33].mxu0 }
 0x24d   : > { %v1944_v49 = vadd.f32 %v1943_v2, %v1942_v32  ;;  %v1945_v53 = vpop.f32.mrb[34].mxu0 }
 0x24e   : > { %v1946_v6 = vpop.f32.mrb[35].mxu0 }
 0x24f   : > { %v1947_v52 = vadd.f32 %v1946_v6, %v1945_v53 }
 0x251   : > { %v1878_v23 = vpack.c.bf16 %v1947_v52, %v1944_v49 }
 0x253   : > { %1898 = vst [vmem:[%s2633_s22 + $0x20] sm:$0xff] %v1878_v23   ;;  %v1948_v11 = vpop.f32.mrb[36].mxu0 }
 0x254   : > { %v1949_v17 = vpop.f32.mrb[37].mxu0 }
 0x255   : > { %v1950_v45 = vadd.f32 %v1949_v17, %v1948_v11  ;;  %v1951_v26 = vpop.f32.mrb[38].mxu0 }
 0x256   : > { %v1952_v36 = vpop.f32.mrb[39].mxu0 }
 0x257   : > { %v1953_v3 = vadd.f32 %v1952_v36, %v1951_v26 }
 0x259   : > { %v1883_v13 = vpack.c.bf16 %v1953_v3, %v1950_v45 }
 0x25b   : > { %1899 = vst [vmem:[%s2633_s22 + $0x28] sm:$0xff] %v1883_v13   ;;  %v1954_v39 = vpop.f32.mrb[40].mxu0 }
 0x25c   : > { %v1955_v37 = vpop.f32.mrb[41].mxu0 }
 0x25d   : > { %v1956_v21 = vadd.f32 %v1955_v37, %v1954_v39  ;;  %v1957_v16 = vpop.f32.mrb[42].mxu0 }
 0x25e   : > { %v1958_v43 = vpop.f32.mrb[43].mxu0 }
 0x25f   : > { %v1959_v51 = vadd.f32 %v1958_v43, %v1957_v16 }
 0x261   : > { %v1888_v31 = vpack.c.bf16 %v1959_v51, %v1956_v21 }
 0x263   : > { %1900 = vst [vmem:[%s2633_s22 + $0x30] sm:$0xff] %v1888_v31   ;;  %v1960_v30 = vpop.f32.mrb[44].mxu0 }
 0x264   : > { %v1961_v1 = vpop.f32.mrb[45].mxu0 }
 0x265   : > { %v1962_v34 = vadd.f32 %v1961_v1, %v1960_v30  ;;  %v1963_v33 = vpop.f32.mrb[46].mxu0 }
 0x266   : > { %v1964_v61 = vpop.f32.mrb[47].mxu0 }
 0x267   : > { %v1965_v22 = vadd.f32 %v1964_v61, %v1963_v33 }
 0x269   : > { %v1893_v60 = vpack.c.bf16 %v1965_v22, %v1962_v34 }
 0x26b   : > { %1901 = vst [vmem:[%s2633_s22 + $0x38] sm:$0xff] %v1893_v60  }
 0x26c PF: > { %s21_s25 = sadd.s32 1, %s2246_s25   ;;  %s2659_s23 = smov %s2242_s24 }
 0x26d   : > { %p18_p12 = scmp.ge.s32.totalorder %s21_s25, 13   ;;  %s2660_s24 = smov %s2662_s0 }
 0x26f   :  { %20 = sbr.rel (!%p18_p12) target bundleno = 17 (0x11), region = 83 }

</bundles_post_ra>
